<compile_context>
chip_gen: v6e
topology: v6e:2x2x1
jax: 0.10.0
libtpu: 0.0.40
codegen_flags: <defaults>
</compile_context>

<pallas_src>
import functools

import jax
import jax.numpy as jnp
from jax.experimental import pallas as pl
from jax.experimental.pallas import tpu as pltpu


def _mlp_head_kernel(h_ref, w_ref, b_ref, o_ref, *, inv_t):
    """Temporal mean of per-frame CLS tokens + linear classifier, one batch tile.

    h_ref: (bB, T, D)   CLS token per frame (already CLS-only via the BlockSpec)
    w_ref: (D, n_pad)   classifier weight, zero-padded to a lane multiple
    b_ref: (1, n_pad)   classifier bias, zero-padded
    o_ref: (bB, n_pad)  f32 logits (padded; wrapper slices back to n_class)
    """
    # Temporal mean with f32 accumulation, without materializing an f32 copy of
    # the whole (bB, T, D) tile.
    pooled = jnp.sum(h_ref[...], axis=1, dtype=jnp.float32) * inv_t   # (bB, D)
    # Matmul on the weight's native dtype (bf16-native MXU on v6e/v7x), f32 acc.
    y = jnp.dot(pooled.astype(w_ref.dtype), w_ref[...],
                preferred_element_type=jnp.float32)                   # (bB, n_pad)
    o_ref[...] = y + b_ref[...].astype(jnp.float32)


def _vmem_budget_bytes():
    """~3/4 of physical VMEM (48 MiB on v7x, 96 MiB on v5e/v6e); safe fallback."""
    try:
        cap = int(pltpu.get_tpu_info().vmem_capacity_bytes)
    except Exception:
        cap = 64 * 1024 * 1024            # conservative fallback (v7x per-TC VMEM)
    return (cap * 3) // 4


def mlp_forward(hidden, w, b, *, B, T, block_b=None):
    """hidden: (B*T, N_tokens, D) DINO last_hidden_state.
    w: (D, n_class) (torch weight transposed), b: (n_class,).
    Returns (B, n_class) f32 logits."""
    BT, N, D = hidden.shape
    assert BT == B * T, "hidden leading dim must be B*T"
    assert D % 128 == 0, "feature dim must be a multiple of 128 (768 for dinov2-base)"
    n_class = w.shape[1]

    # Lane-dense classifier: pad n_class up to a multiple of 128 -> unmasked stores.
    n_pad = max(128, int(pl.cdiv(n_class, 128)) * 128)
    w_pad = jnp.zeros((D, n_pad), w.dtype).at[:, :n_class].set(w)
    b_pad = jnp.zeros((1, n_pad), b.dtype).at[0, :n_class].set(b)

    # Free, contiguous metadata reshape: token axis folded into the lane axis so a
    # last-dim block of size D pinned to block 0 fetches exactly the CLS token
    # (1/N of the HBM traffic; 1/257 for real dinov2-base).
    hidden3 = hidden.reshape(B, T, N * D)

    # ---- VMEM-budgeted, generation-aware batch tile ---------------------------
    h_itemsize = hidden.dtype.itemsize
    sub = max(8, 32 // h_itemsize)                   # sublanes: 8 f32, 16 bf16
    padded_t = int(pl.cdiv(T, sub)) * sub            # sublane padding of the T axis
    budget = _vmem_budget_bytes()

    # Resident operands (weight/bias double-buffered by the pipeline -> count 2x).
    fixed = 2 * (D * n_pad * w_pad.dtype.itemsize + 8 * n_pad * b_pad.dtype.itemsize)
    # Per batch-row: double-buffered hidden block + double-buffered f32 output.
    per_row = 2 * (padded_t * D * h_itemsize) + 2 * (n_pad * 4)

    if block_b is None:
        bB_vmem = max(1, (budget - fixed) // per_row)
        # Keep >=4 grid steps when possible so v7x's 2 TensorCores both get work;
        # per-step overhead (~0.35 us) is negligible at this step count on 1-TC chips.
        bB_split = int(pl.cdiv(B, 4))
        bB = int(max(1, min(bB_vmem, bB_split, B)))
        if B >= sub:
            bB = max(sub, (bB // sub) * sub)         # sublane-aligned tiles/stores
        else:
            bB = B                                    # single tile == full batch
    else:
        bB = int(block_b)
        if bB <= 0:
            raise ValueError("block_b must be positive")
        if B >= sub and bB % sub != 0:
            raise ValueError(f"block_b must be a multiple of {sub} for this dtype")
        if fixed + bB * per_row > budget:
            raise ValueError("block_b does not fit in the VMEM budget")

    b_pad_rows = int(pl.cdiv(B, bB)) * bB
    if b_pad_rows != B:
        hidden3 = jnp.pad(hidden3, ((0, b_pad_rows - B), (0, 0), (0, 0)))

    kernel = functools.partial(_mlp_head_kernel, inv_t=float(1.0 / T))

    out = pl.pallas_call(
        kernel,
        out_shape=jax.ShapeDtypeStruct((b_pad_rows, n_pad), jnp.float32),
        grid_spec=pltpu.PrefetchScalarGridSpec(
            num_scalar_prefetch=0,
            grid=(b_pad_rows // bB,),
            in_specs=[
                # CLS-only stream: last-dim block D pinned to block 0 of N*D.
                pl.BlockSpec((bB, T, D), lambda i: (i, 0, 0)),
                # Weight / bias: constant block index -> DMA'd once, VMEM-resident.
                pl.BlockSpec((D, n_pad), lambda i: (0, 0)),
                pl.BlockSpec((1, n_pad), lambda i: (0, 0)),
            ],
            out_specs=pl.BlockSpec((bB, n_pad), lambda i: (i, 0)),
        ),
        compiler_params=pltpu.CompilerParams(
            dimension_semantics=("parallel",),        # megacore-shardable on v7x
            vmem_limit_bytes=int(budget),             # matches the tiling budget
        ),
    )(hidden3, w_pad, b_pad)

    return out[:B, :n_class]


if __name__ == "__main__":
    # Small shapes consistent with the module's forward:
    #   original video input would be (B, C, T, H, W) = (2, 3, 4, 16, 16);
    #   the frozen backbone maps each frame to (N_tokens, D) hidden states.
    B, T = 2, 4
    N_TOKENS = 5          # 1 CLS + 4 patch tokens (synthetic)
    DIM = 128             # feature dim ("dim" in the module; 768 for dinov2-base)
    N_CLASS = 8

    key = jax.random.PRNGKey(0)
    k_h, k_w, k_b = jax.random.split(key, 3)

    hidden = jax.random.normal(k_h, (B * T, N_TOKENS, DIM), dtype=jnp.float32)
    # nn.Linear(dim, n_class): weight (n_class, dim), bias (n_class,)
    w_torch = jax.random.normal(k_w, (N_CLASS, DIM), dtype=jnp.float32) * 0.02
    bias = jax.random.normal(k_b, (N_CLASS,), dtype=jnp.float32) * 0.02
    w = w_torch.T  # (DIM, N_CLASS) for x @ W

    out = mlp_forward(hidden, w, bias, B=B, T=T)
    out = jax.block_until_ready(out)

    # pure-JAX reference of the same head
    ref = hidden.reshape(B, T, N_TOKENS, DIM)[:, :, 0, :].mean(axis=1) @ w + bias
    assert out.shape == (B, N_CLASS)
    assert out.dtype == jnp.float32
    assert jnp.allclose(out, ref, atol=1e-5, rtol=1e-5), "mismatch vs reference"

    print("KERNEL_OK")
</pallas_src>

<mosaic_0001>
module attributes {stable_mosaic.version = 11 : i64} {
  func.func @_mlp_head_kernel(%arg0: i32, %arg1: memref<2x4x128xf32, #tpu.memory_space<vmem>>, %arg2: memref<128x128xf32, #tpu.memory_space<vmem>>, %arg3: memref<1x128xf32, #tpu.memory_space<vmem>>, %arg4: memref<2x128xf32, #tpu.memory_space<vmem>>) attributes {dimension_semantics = [#tpu.dimension_semantics<parallel>], iteration_bounds = array<i64: 1>, scalar_prefetch = 0 : i64, scratch_operands = 0 : i64, tpu.core_type = #tpu.core_type<tc>, window_params = [{transform_indices = @transform_0, window_bounds = array<i64: 2, 4, 128>}, {pipeline_mode = #tpu.pipeline_mode<synchronous>, transform_indices = @transform_1, window_bounds = array<i64: 128, 128>}, {pipeline_mode = #tpu.pipeline_mode<synchronous>, transform_indices = @transform_2, window_bounds = array<i64: 1, 128>}, {transform_indices = @transform_3, window_bounds = array<i64: 2, 128>}]} {
    %c0 = arith.constant 0 : index
    %c0_0 = arith.constant 0 : index
    %c0_1 = arith.constant 0 : index
    %0 = vector.load %arg1[%c0, %c0_0, %c0_1] : memref<2x4x128xf32, #tpu.memory_space<vmem>>, vector<2x4x128xf32>
    %cst = arith.constant dense<0.000000e+00> : vector<2x128xf32>
    %1 = vector.multi_reduction <add>, %0, %cst [1] : vector<2x4x128xf32> to vector<2x128xf32>
    %cst_2 = arith.constant 2.500000e-01 : f32
    %2 = vector.broadcast %cst_2 : f32 to vector<2x128xf32>
    %3 = arith.mulf %1, %2 : vector<2x128xf32>
    %c0_3 = arith.constant 0 : index
    %c0_4 = arith.constant 0 : index
    %4 = vector.load %arg2[%c0_3, %c0_4] : memref<128x128xf32, #tpu.memory_space<vmem>>, vector<128x128xf32>
    %cst_5 = arith.constant dense<0.000000e+00> : vector<2x128xf32>
    %5 = tpu.matmul %3, %4, %cst_5 {dimension_numbers = #tpu.dot_dimension_numbers<[1], [0], [0], [1], [0, 0, 1, 1], [], []>} : vector<2x128xf32>, vector<128x128xf32>, vector<2x128xf32> -> vector<2x128xf32>
    %c0_6 = arith.constant 0 : index
    %c0_7 = arith.constant 0 : index
    %6 = vector.load %arg3[%c0_6, %c0_7] : memref<1x128xf32, #tpu.memory_space<vmem>>, vector<1x128xf32>
    %7 = vector.broadcast %6 : vector<1x128xf32> to vector<2x128xf32>
    %8 = arith.addf %5, %7 : vector<2x128xf32>
    %c0_8 = arith.constant 0 : index
    %c0_9 = arith.constant 0 : index
    %9 = vector.load %arg4[%c0_8, %c0_9] : memref<2x128xf32, #tpu.memory_space<vmem>>, vector<2x128xf32>
    tpu.vector_store %arg4[%c0_8, %c0_9], %8 {strides = array<i32>} : memref<2x128xf32, #tpu.memory_space<vmem>>, vector<2x128xf32>,
    return
  }
  func.func @transform_0(%arg0: i32) -> (i32, i32, i32) {
    %c0_i32 = arith.constant 0 : i32
    %c0_i32_0 = arith.constant 0 : i32
    %c0_i32_1 = arith.constant 0 : i32
    return %arg0, %c0_i32, %c0_i32_0 : i32, i32, i32
  }
  func.func @transform_1(%arg0: i32) -> (i32, i32) {
    %c0_i32 = arith.constant 0 : i32
    %c0_i32_0 = arith.constant 0 : i32
    %c0_i32_1 = arith.constant 0 : i32
    return %c0_i32, %c0_i32_0 : i32, i32
  }
  func.func @transform_2(%arg0: i32) -> (i32, i32) {
    %c0_i32 = arith.constant 0 : i32
    %c0_i32_0 = arith.constant 0 : i32
    %c0_i32_1 = arith.constant 0 : i32
    return %c0_i32, %c0_i32_0 : i32, i32
  }
  func.func @transform_3(%arg0: i32) -> (i32, i32) {
    %c0_i32 = arith.constant 0 : i32
    %c0_i32_0 = arith.constant 0 : i32
    return %arg0, %c0_i32 : i32, i32
  }
}

</mosaic_0001>

<bundles_post_ra>
// kernel: tpu_custom_call.1
= control target key start
LH: loop header
LB: loop body
LE: loop exit
PB: predicated region body
PF: predicated region fallthrough
CT: control target
= control target key end

     0   :  { %8 = vsyncpa [#allocation3], 0  ;;  %s365_s0 = inlined_call_operand.hbm [shape: f32[2,4,640], index: 0, kind: input, shape index: {}]   ;;  %s366_s1 = inlined_call_operand.hbm [shape: f32[128,128], index: 1, kind: input, shape index: {}]   ;;  %s367_s2 = inlined_call_operand.vmem [shape: f32[1,128], index: 2, kind: input, shape index: {}]   ;;  %s368_s3 = inlined_call_operand.hbm [shape: f32[2,128], index: 3, kind: output, shape index: {}]  }
   0x1   :  { %9 = vsyncpa [#allocation6], 0 }
   0x2   :  { %10 = vsyncpa [#allocation4], 0  ;;  %s306_s12 = smov [#allocation2]  }
   0x3   :  { %s16_s13 = sshll.u32 %s306_s12, 4  ;;  %s17_s13 = int_to_ptr.vmem [resolvable:$true] %s16_s13 }
   0x4   :  { %s248_s14 = scalar_lea.vmem %s17_s13, 128  ;;  %p253_p1 = scmp.lt.s32.totalorder %s17_s13, %s17_s13 }
   0x5   :  { %p249_p0 = scmp.ne.s32.totalorder %s17_s13, %s248_s14  ;;  %p254_p2 = scmp.lt.s32.totalorder %s248_s14, %s248_s14 }
   0x7   :  { %p255_p3 = por %p254_p2, %p253_p1 }
   0x9   :  { %p256_p4 = pnand %p255_p3, %p249_p0 }
   0xb   :  { %259 = shalt.err (!%p256_p4)
}
   0xc   :  { %s307_s15 = smov 320   ;;  %s308_s16 = smov 64  }
   0xd   :  { %s309_s17 = smov 4   ;;  %s310_s20 = smov [#allocation5]  }
   0xe   :  { %22 = dma.hbm_to_vmem [thread:$0]  %s365_s0, 128, %s17_s13, [#allocation3], %s307_s15, %s308_s16, %s309_s17  }
   0xf   :  { %s28_s21 = sshll.u32 %s310_s20, 4  ;;  %s29_s21 = int_to_ptr.vmem [resolvable:$true] %s28_s21 }
  0x10   :  { %s268_s22 = scalar_lea.vmem %s29_s21, 2048  ;;  %p273_p6 = scmp.lt.s32.totalorder %s29_s21, %s29_s21 }
  0x11   :  { %p269_p5 = scmp.ne.s32.totalorder %s29_s21, %s268_s22  ;;  %p274_p7 = scmp.lt.s32.totalorder %s268_s22, %s268_s22 }
  0x13   :  { %p275_p8 = por %p274_p7, %p273_p6 }
  0x15   :  { %p276_p9 = pnand %p275_p8, %p269_p5 }
  0x17   :  { %279 = shalt.err (!%p276_p9)
}
  0x18   :  { %s311_s23 = smov 128   ;;  %s312_s24 = smov 8  }
  0x19   :  { %34 = dma.hbm_to_vmem [thread:$0]  %s366_s1, 2048, %s29_s21, [#allocation6], %s311_s23, %s311_s23, %s312_s24  }
  0x1a   :  { %300 = dma.done.wait [#allocation3], 128  }
  0x1b   :  { %301 = vsyncadd [#allocation3], 4294967168 }
  0x1c   :  { %302 = dma.done.wait [#allocation6], 2048  }
  0x1d   :  { %303 = vsyncadd [#allocation6], 4294965248  ;;  %v313_v0 = vmov 0.0   ;;  %vm314_vm0 = vmmov 0   ;;  %v77_v1 = vld [vmem:[#allocation5 + $0x78] sm:$0xff]  ;;  %v76_v2 = vld [vmem:[#allocation5 + $0x70] sm:$0xff] }
  0x1e   :  { %195 = vmatprep.subr.mxu0 %v313_v0  ;;  %227 = vmatprep.mubr.msk.f32.mxu0 %vm314_vm0, %v313_v0  ;;  %v75_v3 = vld [vmem:[#allocation5 + $0x68] sm:$0xff]  ;;  %vm45_vm1 = vcmask 1043456   ;;  %v74_v4 = vld [vmem:[#allocation5 + $0x60] sm:$0xff]  ;;  %v43_v5 = vld [vmem:[#allocation2] sm:$0xf]  ;;  %vm87_vm2 = vcmask 1041409  }
  0x1f   :  { %196 = vmatpush3.msra.mxu0 %v77_v1  ;;  %v44_v6 = vld [vmem:[#allocation2 + $0x4] sm:$0xf]  ;;  %v46_v8 = vsel %vm45_vm1, %v43_v5, 0.0  ;;  %v72_v12 = vld [vmem:[#allocation5 + $0x50] sm:$0xff]  ;;  %v71_v15 = vld [vmem:[#allocation5 + $0x48] sm:$0xff]  ;;  %s315_s27 = smov [#allocation7]  }
  0x20   :  { %197 = vmatprep.subr.mxu0 %v313_v0  ;;  %v73_v7 = vld [vmem:[#allocation5 + $0x58] sm:$0xff]  ;;  %v53_v9 = vsel %vm45_vm1, %v44_v6, 0.0  ;;  %v47_v10 = vrot.slane %v46_v8, 4  ;;  %v70_v18 = vld [vmem:[#allocation5 + $0x40] sm:$0xff]  ;;  %v68_v22 = vld [vmem:[#allocation5 + $0x30] sm:$0xff]  ;;  %s167_s28 = sshll.u32 %s315_s27, 4  ;;  %s168_s28 = int_to_ptr.vmem [resolvable:$true] %s167_s28 }
  0x21   :  { %198 = vmatpush3.msra.mxu0 %v76_v2  ;;  %v54_v11 = vrot.slane %v53_v9, 4  ;;  %v69_v21 = vld [vmem:[#allocation5 + $0x38] sm:$0xff]  ;;  %v67_v25 = vld [vmem:[#allocation5 + $0x28] sm:$0xff]  ;;  %v66_v26 = vld [vmem:[#allocation5 + $0x20] sm:$0xff]  ;;  %s280_s29 = scalar_lea.vmem %s168_s28, 32  ;;  %p285_p11 = scmp.lt.s32.totalorder %s168_s28, %s168_s28 }
  0x22   :  { %199 = vmatprep.subr.mxu0 %v313_v0  ;;  %v48_v13 = vadd.f32 %v47_v10, %v46_v8  ;;  %v65_v29 = vld [vmem:[#allocation5 + $0x18] sm:$0xff]  ;;  %v64_v30 = vld [vmem:[#allocation5 + $0x10] sm:$0xff]  ;;  %v63_v33 = vld [vmem:[#allocation5 + $0x8] sm:$0xff]  ;;  %p281_p10 = scmp.ne.s32.totalorder %s168_s28, %s280_s29  ;;  %p286_p12 = scmp.lt.s32.totalorder %s280_s29, %s280_s29 }
  0x23   :  { %200 = vmatpush3.msra.mxu0 %v75_v3  ;;  %v55_v14 = vadd.f32 %v54_v11, %v53_v9  ;;  %v62_v34 = vld [vmem:[#allocation5] sm:$0xff]  ;;  %v177_v36 = vld [vmem:[%s367_s2] ss:$0 sm:$0xff] }
  0x24   :  { %201 = vmatprep.subr.mxu0 %v313_v0  ;;  %v49_v16 = vrot.slane %v48_v13, 2  ;;  %p287_p13 = por %p286_p12, %p285_p11 }
  0x25   :  { %202 = vmatpush3.msra.mxu0 %v74_v4  ;;  %v56_v17 = vrot.slane %v55_v14, 2 }
  0x26   :  { %203 = vmatprep.subr.mxu0 %v313_v0  ;;  %v50_v19 = vadd.f32 %v49_v16, %v48_v13  ;;  %p288_p0 = pnand %p287_p13, %p281_p10 }
  0x27   :  { %204 = vmatpush3.msra.mxu0 %v73_v7  ;;  %v57_v20 = vadd.f32 %v56_v17, %v55_v14 }
  0x28   :  { %205 = vmatprep.subr.mxu0 %v313_v0  ;;  %v51_v23 = vrot.slane %v50_v19, 1 }
  0x29   :  { %206 = vmatpush3.msra.mxu0 %v72_v12  ;;  %v58_v24 = vrot.slane %v57_v20, 1 }
  0x2a   :  { %207 = vmatprep.subr.mxu0 %v313_v0  ;;  %v52_v27 = vadd.f32 %v51_v23, %v50_v19 }
  0x2b   :  { %208 = vmatpush3.msra.mxu0 %v71_v15  ;;  %v59_v28 = vadd.f32 %v58_v24, %v57_v20 }
  0x2c   :  { %209 = vmatprep.subr.mxu0 %v313_v0  ;;  %v60_v31 = vmul.f32 0.25, %v52_v27 }
  0x2d   :  { %210 = vmatpush3.msra.mxu0 %v70_v18  ;;  %v61_v32 = vmul.f32 0.25, %v59_v28 }
  0x2e   :  { %211 = vmatprep.subr.mxu0 %v313_v0 }
  0x2f   :  { %212 = vmatpush3.msra.mxu0 %v69_v21  ;;  %v88_v35 = vsel %vm87_vm2, %v61_v32, %v60_v31 }
  0x30   :  { %213 = vmatprep.subr.mxu0 %v313_v0 }
  0x31   :  { %214 = vmatpush3.msra.mxu0 %v68_v22 }
  0x32   :  { %215 = vmatprep.subr.mxu0 %v313_v0 }
  0x33   :  { %216 = vmatpush3.msra.mxu0 %v67_v25 }
  0x34   :  { %217 = vmatprep.subr.mxu0 %v313_v0 }
  0x35   :  { %218 = vmatpush3.msra.mxu0 %v66_v26 }
  0x36   :  { %219 = vmatprep.subr.mxu0 %v313_v0 }
  0x37   :  { %220 = vmatpush3.msra.mxu0 %v65_v29 }
  0x38   :  { %221 = vmatprep.subr.mxu0 %v313_v0 }
  0x39   :  { %222 = vmatpush3.msra.mxu0 %v64_v30 }
  0x3a   :  { %223 = vmatprep.subr.mxu0 %v313_v0 }
  0x3b   :  { %224 = vmatpush3.msra.mxu0 %v63_v33 }
  0x3c   :  { %225 = vmatprep.subr.mxu0 %v313_v0 }
  0x3d   :  { %226 = vmatpush3.msra.mxu0 %v62_v34 }
  0x3e   :  { %228 = vmatmul.mubr.f32.vlgmr.msra.gmra.mxu0 %v88_v35 }
  0xfe   :  { %v156_v37 = vpop.f32.mrf.mxu0 }
  0xff   :  { %v157_v38 = vadd.f32 %v177_v36, %v156_v37 }
 0x100   :  { %v229_v39 = vpop.f32.mrf.mxu0 }
 0x101   :  { %160 = vst [vmem:[#allocation7] sm:$0x3] %v157_v38 }
 0x102   :  { %291 = shalt.err (!%p288_p0)
}
 0x103   :  { %170 = dma.vmem_to_hbm [thread:$0]  %s168_s28, 32, %s368_s3, [#allocation4]  }
 0x104   :  { %304 = dma.done.wait [#allocation4], 32  }
 0x105   :  { %305 = vsyncadd [#allocation4], 4294967264 }
 0x106   :  { %174 = vsyncpa [#allocation3], 1 }
 0x107   :  { %175 = vsyncpa [#allocation6], 1 }
 0x108   :  { %176 = vsyncpa [#allocation4], 1 }

</bundles_post_ra>
